<compile_context>
chip_gen: v7x
topology: tpu7x:2x2x1
jax: 0.10.0
libtpu: 0.0.40
codegen_flags: <defaults>
</compile_context>

<pallas_src>
import math
import functools

import jax
import jax.numpy as jnp
import numpy as np
from jax import lax
from jax.experimental import pallas as pl
from jax.experimental.pallas import tpu as pltpu


# -----------------------------------------------------------------------------
# Helpers (traced inside the Pallas kernel and in the pure-JAX reference)
# -----------------------------------------------------------------------------
def _layernorm(x, gamma, beta, eps=1e-5):
    mu = jnp.mean(x, axis=-1, keepdims=True)
    var = jnp.mean((x - mu) ** 2, axis=-1, keepdims=True)
    return (x - mu) * lax.rsqrt(var + eps) * gamma + beta


def _gelu(x):
    # TODO(synk): PyTorch nn.GELU() default is the exact erf formulation; the
    # tanh approximation is used for guaranteed Mosaic (EUP tanh) lowering.
    c = math.sqrt(2.0 / math.pi)
    return 0.5 * x * (1.0 + jnp.tanh(c * (x + 0.044715 * x * x * x)))


# -----------------------------------------------------------------------------
# Pallas kernel: one grid step == one batch-block's full encoder layer
# -----------------------------------------------------------------------------
def encoder_kernel(num_heads, head_dim,
                   x_ref, pe_ref, wqkv_ref, wo_ref, w1_ref, w2_ref, pk_ref,
                   o_ref):
    BB, S, E = x_ref.shape
    F = w1_ref.shape[1]
    H, Dh = num_heads, head_dim
    f32 = jnp.float32
    bf16 = jnp.bfloat16

    # Packed small parameters: a single (8, 128) f32 tile.
    pk = pk_ref[...]
    b_qkv = pk[0:1, 0:3 * E]          # fused QKV bias (Q part pre-scaled)
    b_o   = pk[1:2, 0:E]
    g1    = pk[2:3, 0:E]
    be1   = pk[3:4, 0:E]
    b_f1  = pk[4:5, 0:F]
    b_f2  = pk[5:6, 0:E]
    g2    = pk[6:7, 0:E]
    be2   = pk[7:8, 0:E]

    # positional encoding + flatten tokens (leading-dim reshape only)
    x = x_ref[...] + pe_ref[...]                          # (BB, S, E) f32
    x2d = x.reshape(BB * S, E)

    # Fused QKV projection: one bf16 MXU matmul, f32 accumulation.
    qkv = jnp.dot(x2d.astype(bf16), wqkv_ref[...],
                  preferred_element_type=f32) + b_qkv     # (BB*S, 3E)

    # Scores for every (batch, head) pair; contraction on the last dims of both
    # operands folds the K transpose into the matmul.
    dn = (((1,), (1,)), ((), ()))
    scores = []
    for b in range(BB):
        r = b * S
        for h in range(H):
            c = h * Dh
            qh = qkv[r:r + S, c:c + Dh].astype(bf16)
            kh = qkv[r:r + S, E + c:E + c + Dh].astype(bf16)
            scores.append(lax.dot_general(qh, kh, dn,
                                          preferred_element_type=f32))
    s_all = jnp.stack(scores, axis=0)                     # (BB*H, S, S)

    # Batched softmax over all heads at once; divide moved onto the EUP.
    m = jnp.max(s_all, axis=-1, keepdims=True)
    p = jnp.exp(s_all - m)
    p = p * pl.reciprocal(jnp.sum(p, axis=-1, keepdims=True), approx=True)

    # Context + output projection fused per head:
    #   concat_h(ctx_h) @ Wo == sum_h ctx_h @ Wo[h*Dh:(h+1)*Dh, :]
    # wo_ref is pre-split per head on the host, so there is no lane-dim concat.
    attn_rows = []
    for b in range(BB):
        r = b * S
        acc = jnp.zeros((S, E), f32)
        for h in range(H):
            c = 2 * E + h * Dh
            vh = qkv[r:r + S, c:c + Dh].astype(bf16)
            ph = p[b * H + h].astype(bf16)
            ctx = jnp.dot(ph, vh, preferred_element_type=f32)       # (S, Dh)
            acc = acc + jnp.dot(ctx.astype(bf16), wo_ref[h],
                                preferred_element_type=f32)         # (S, E)
        attn_rows.append(acc)
    attn = attn_rows[0] if BB == 1 else jnp.concatenate(attn_rows, axis=0)
    attn = attn + b_o

    # residual + LayerNorm1 (dropout == identity in eval mode)
    x1 = _layernorm(x2d + attn, g1, be1)

    # feed-forward
    h1 = jnp.dot(x1.astype(bf16), w1_ref[...],
                 preferred_element_type=f32) + b_f1
    h1 = _gelu(h1)
    ff = jnp.dot(h1.astype(bf16), w2_ref[...],
                 preferred_element_type=f32) + b_f2

    # residual + LayerNorm2
    x2 = _layernorm(x1 + ff, g2, be2)
    o_ref[...] = x2.reshape(BB, S, E)


# -----------------------------------------------------------------------------
# Host-side wrapper
# -----------------------------------------------------------------------------
def make_positional_encoding(seq_len, embed_dim):
    pe = np.zeros((seq_len, embed_dim), dtype=np.float32)
    position = np.arange(0, seq_len, dtype=np.float32)[:, None]
    div_term = np.exp(np.arange(0, embed_dim, 2, dtype=np.float32)
                      * -(math.log(10000.0) / embed_dim))
    pe[:, 0::2] = np.sin(position * div_term)
    pe[:, 1::2] = np.cos(position * div_term)
    return jnp.asarray(pe)


def init_params(key, embed_dim, num_heads, ff_hidden_dim):
    E, F = embed_dim, ff_hidden_dim
    ks = jax.random.split(key, 9)
    s = 0.02
    return {
        # MultiheadAttention in/out projections (stored transposed: y = x @ W^T)
        "wqT": s * jax.random.normal(ks[0], (E, E), jnp.float32),
        "wkT": s * jax.random.normal(ks[1], (E, E), jnp.float32),
        "wvT": s * jax.random.normal(ks[2], (E, E), jnp.float32),
        "bq": jnp.zeros((1, E), jnp.float32),   # PyTorch in_proj_bias init is 0
        "bk": jnp.zeros((1, E), jnp.float32),
        "bv": jnp.zeros((1, E), jnp.float32),
        "woT": s * jax.random.normal(ks[3], (E, E), jnp.float32),
        "bo": s * jax.random.normal(ks[4], (1, E), jnp.float32),
        # LayerNorm1
        "g1": jnp.ones((1, E), jnp.float32),
        "be1": jnp.zeros((1, E), jnp.float32),
        # FFN
        "w1T": s * jax.random.normal(ks[5], (E, F), jnp.float32),
        "bf1": s * jax.random.normal(ks[6], (1, F), jnp.float32),
        "w2T": s * jax.random.normal(ks[7], (F, E), jnp.float32),
        "bf2": s * jax.random.normal(ks[8], (1, E), jnp.float32),
        # LayerNorm2
        "g2": jnp.ones((1, E), jnp.float32),
        "be2": jnp.zeros((1, E), jnp.float32),
    }


def encoder_forward(x, params, pe, *, embed_dim, num_heads,
                    positional_embed_flag=True):
    B, ctx_len = x.shape
    E = embed_dim
    S = ctx_len // E
    H = num_heads
    Dh = E // H
    F = params["w1T"].shape[1]

    # At most 2 batch blocks: v7x's two TensorCores each take half the batch
    # ("parallel" grid axis); on v5e/v6e this costs one extra tiny grid step.
    NB = 2 if (B >= 2 and B % 2 == 0) else 1
    BB = B // NB

    x3 = x.reshape(B, S, E).astype(jnp.float32)
    pe_use = (pe[:S] if positional_embed_flag
              else jnp.zeros((S, E))).astype(jnp.float32)

    # Fused QKV weight/bias with the 1/sqrt(Dh) scale folded into the Q part
    # (mathematically identical to scaling Q after the projection).
    scale = 1.0 / math.sqrt(Dh)
    wqkv = jnp.concatenate(
        [params["wqT"] * scale, params["wkT"], params["wvT"]],
        axis=1).astype(jnp.bfloat16)                                   # (E, 3E)
    bqkv = jnp.concatenate(
        [params["bq"] * scale, params["bk"], params["bv"]], axis=1)    # (1, 3E)
    wo = params["woT"].reshape(H, Dh, E).astype(jnp.bfloat16)          # per head
    w1 = params["w1T"].astype(jnp.bfloat16)
    w2 = params["w2T"].astype(jnp.bfloat16)

    # Pack all small vectors into a single (8, 128) f32 tile (one DMA, one ref).
    def row(v, width):
        r = jnp.zeros((1, 128), jnp.float32)
        return r.at[0, :width].set(jnp.reshape(v, (-1,)).astype(jnp.float32))
    packed = jnp.concatenate([
        row(bqkv, 3 * E), row(params["bo"], E),
        row(params["g1"], E), row(params["be1"], E),
        row(params["bf1"], F), row(params["bf2"], E),
        row(params["g2"], E), row(params["be2"], E)], axis=0)          # (8, 128)

    kernel = functools.partial(encoder_kernel, H, Dh)

    def fixed(shape):
        nd = len(shape)
        return pl.BlockSpec(shape, lambda b, _nd=nd: (0,) * _nd)

    out3 = pl.pallas_call(
        kernel,
        out_shape=jax.ShapeDtypeStruct((B, S, E), jnp.float32),
        grid_spec=pltpu.PrefetchScalarGridSpec(
            num_scalar_prefetch=0,
            grid=(NB,),
            in_specs=[
                pl.BlockSpec((BB, S, E), lambda b: (b, 0, 0)),   # x
                fixed((S, E)),                                   # positional enc
                fixed((E, 3 * E)),                               # fused QKV weight
                fixed((H, Dh, E)),                               # per-head out proj
                fixed((E, F)),                                   # FFN W1
                fixed((F, E)),                                   # FFN W2
                fixed((8, 128)),                                 # packed biases / LN
            ],
            out_specs=pl.BlockSpec((BB, S, E), lambda b: (b, 0, 0)),
        ),
        compiler_params=pltpu.CompilerParams(
            dimension_semantics=("parallel",)),
    )(x3, pe_use, wqkv, wo, w1, w2, packed)
    return out3.reshape(B, S * E)


# -----------------------------------------------------------------------------
# Pure-JAX reference (same math, f32, exact division) for a sanity check
# -----------------------------------------------------------------------------
def encoder_reference(x, params, pe, *, embed_dim, num_heads,
                      positional_embed_flag=True):
    B, ctx_len = x.shape
    E = embed_dim
    S = ctx_len // E
    H = num_heads
    Dh = E // H
    x3 = x.reshape(B, S, E).astype(jnp.float32)
    if positional_embed_flag:
        x3 = x3 + pe[:S]
    q = x3 @ params["wqT"] + params["bq"]
    k = x3 @ params["wkT"] + params["bk"]
    v = x3 @ params["wvT"] + params["bv"]
    qh = q.reshape(B, S, H, Dh).transpose(0, 2, 1, 3)
    kh = k.reshape(B, S, H, Dh).transpose(0, 2, 1, 3)
    vh = v.reshape(B, S, H, Dh).transpose(0, 2, 1, 3)
    s = jnp.einsum("bhqd,bhkd->bhqk", qh, kh) / math.sqrt(Dh)
    p = jax.nn.softmax(s, axis=-1)
    ctx = jnp.einsum("bhqk,bhkd->bhqd", p, vh)
    ctx = ctx.transpose(0, 2, 1, 3).reshape(B, S, E)
    attn = ctx @ params["woT"] + params["bo"]
    x1 = _layernorm(x3 + attn, params["g1"], params["be1"])
    h1 = _gelu(x1 @ params["w1T"] + params["bf1"])
    ff = h1 @ params["w2T"] + params["bf2"]
    x2 = _layernorm(x1 + ff, params["g2"], params["be2"])
    return x2.reshape(B, S * E)


if __name__ == "__main__":
    # Small shapes consistent with the module's forward:
    # embed_dim=32, num_heads=4, ff_hidden_dim=64, seq_length=8, batch=2
    EMBED_DIM = 32
    NUM_HEADS = 4
    FF_HIDDEN = 64
    SEQ_LEN = 8
    BATCH = 2
    CONTEXT_LEN = SEQ_LEN * EMBED_DIM  # 256

    key = jax.random.PRNGKey(0)
    k_x, k_p = jax.random.split(key)
    x = jax.random.normal(k_x, (BATCH, CONTEXT_LEN), jnp.float32)

    params = init_params(k_p, EMBED_DIM, NUM_HEADS, FF_HIDDEN)
    pe = make_positional_encoding(SEQ_LEN, EMBED_DIM)

    out = encoder_forward(x, params, pe,
                          embed_dim=EMBED_DIM,
                          num_heads=NUM_HEADS,
                          positional_embed_flag=True)
    out = jax.block_until_ready(out)
    assert out.shape == (BATCH, CONTEXT_LEN), out.shape
    assert bool(jnp.all(jnp.isfinite(out)))

    ref = encoder_reference(x, params, pe,
                            embed_dim=EMBED_DIM,
                            num_heads=NUM_HEADS,
                            positional_embed_flag=True)
    max_err = float(jnp.max(jnp.abs(out - ref)))
    assert max_err < 1e-1, f"max abs error vs reference: {max_err}"
    print("KERNEL_OK")
</pallas_src>

<mosaic_0001>
module attributes {stable_mosaic.version = 11 : i64} {
  func.func @encoder_kernel(%arg0: i32, %arg1: memref<1x8x32xf32, #tpu.memory_space<vmem>>, %arg2: memref<8x32xf32, #tpu.memory_space<vmem>>, %arg3: memref<32x96xbf16, #tpu.memory_space<vmem>>, %arg4: memref<4x8x32xbf16, #tpu.memory_space<vmem>>, %arg5: memref<32x64xbf16, #tpu.memory_space<vmem>>, %arg6: memref<64x32xbf16, #tpu.memory_space<vmem>>, %arg7: memref<8x128xf32, #tpu.memory_space<vmem>>, %arg8: memref<1x8x32xf32, #tpu.memory_space<vmem>>) attributes {dimension_semantics = [#tpu.dimension_semantics<parallel>], iteration_bounds = array<i64: 2>, scalar_prefetch = 0 : i64, scratch_operands = 0 : i64, tpu.core_type = #tpu.core_type<tc>, window_params = [{transform_indices = @transform_0, window_bounds = array<i64: 1, 8, 32>}, {pipeline_mode = #tpu.pipeline_mode<synchronous>, transform_indices = @transform_1, window_bounds = array<i64: 8, 32>}, {pipeline_mode = #tpu.pipeline_mode<synchronous>, transform_indices = @transform_2, window_bounds = array<i64: 32, 96>}, {pipeline_mode = #tpu.pipeline_mode<synchronous>, transform_indices = @transform_3, window_bounds = array<i64: 4, 8, 32>}, {pipeline_mode = #tpu.pipeline_mode<synchronous>, transform_indices = @transform_4, window_bounds = array<i64: 32, 64>}, {pipeline_mode = #tpu.pipeline_mode<synchronous>, transform_indices = @transform_5, window_bounds = array<i64: 64, 32>}, {pipeline_mode = #tpu.pipeline_mode<synchronous>, transform_indices = @transform_6, window_bounds = array<i64: 8, 128>}, {transform_indices = @transform_7, window_bounds = array<i64: 1, 8, 32>}]} {
    %c0 = arith.constant 0 : index
    %c0_0 = arith.constant 0 : index
    %0 = vector.load %arg7[%c0, %c0_0] : memref<8x128xf32, #tpu.memory_space<vmem>>, vector<8x128xf32>
    %1 = vector.extract_strided_slice %0 {offsets = [0, 0], sizes = [1, 96], strides = [1, 1]} : vector<8x128xf32> to vector<1x96xf32>
    %2 = vector.extract_strided_slice %0 {offsets = [1, 0], sizes = [1, 32], strides = [1, 1]} : vector<8x128xf32> to vector<1x32xf32>
    %3 = vector.extract_strided_slice %0 {offsets = [2, 0], sizes = [1, 32], strides = [1, 1]} : vector<8x128xf32> to vector<1x32xf32>
    %4 = vector.extract_strided_slice %0 {offsets = [3, 0], sizes = [1, 32], strides = [1, 1]} : vector<8x128xf32> to vector<1x32xf32>
    %5 = vector.extract_strided_slice %0 {offsets = [4, 0], sizes = [1, 64], strides = [1, 1]} : vector<8x128xf32> to vector<1x64xf32>
    %6 = vector.extract_strided_slice %0 {offsets = [5, 0], sizes = [1, 32], strides = [1, 1]} : vector<8x128xf32> to vector<1x32xf32>
    %7 = vector.extract_strided_slice %0 {offsets = [6, 0], sizes = [1, 32], strides = [1, 1]} : vector<8x128xf32> to vector<1x32xf32>
    %8 = vector.extract_strided_slice %0 {offsets = [7, 0], sizes = [1, 32], strides = [1, 1]} : vector<8x128xf32> to vector<1x32xf32>
    %c0_1 = arith.constant 0 : index
    %c0_2 = arith.constant 0 : index
    %c0_3 = arith.constant 0 : index
    %9 = vector.load %arg1[%c0_1, %c0_2, %c0_3] : memref<1x8x32xf32, #tpu.memory_space<vmem>>, vector<1x8x32xf32>
    %c0_4 = arith.constant 0 : index
    %c0_5 = arith.constant 0 : index
    %10 = vector.load %arg2[%c0_4, %c0_5] : memref<8x32xf32, #tpu.memory_space<vmem>>, vector<8x32xf32>
    %11 = vector.shape_cast %10 : vector<8x32xf32> to vector<1x8x32xf32>
    %12 = arith.addf %9, %11 : vector<1x8x32xf32>
    %13 = vector.shape_cast %12 : vector<1x8x32xf32> to vector<8x32xf32>
    %14 = arith.truncf %13 : vector<8x32xf32> to vector<8x32xbf16>
    %c0_6 = arith.constant 0 : index
    %c0_7 = arith.constant 0 : index
    %15 = vector.load %arg3[%c0_6, %c0_7] : memref<32x96xbf16, #tpu.memory_space<vmem>>, vector<32x96xbf16>
    %cst = arith.constant dense<0.000000e+00> : vector<8x96xf32>
    %16 = tpu.matmul %14, %15, %cst {dimension_numbers = #tpu.dot_dimension_numbers<[1], [0], [0], [1], [0, 0, 1, 1], [], []>} : vector<8x32xbf16>, vector<32x96xbf16>, vector<8x96xf32> -> vector<8x96xf32>
    %17 = vector.broadcast %1 : vector<1x96xf32> to vector<8x96xf32>
    %18 = arith.addf %16, %17 : vector<8x96xf32>
    %19 = vector.extract_strided_slice %18 {offsets = [0, 0], sizes = [8, 8], strides = [1, 1]} : vector<8x96xf32> to vector<8x8xf32>
    %20 = arith.truncf %19 : vector<8x8xf32> to vector<8x8xbf16>
    %21 = vector.extract_strided_slice %18 {offsets = [0, 32], sizes = [8, 8], strides = [1, 1]} : vector<8x96xf32> to vector<8x8xf32>
    %22 = arith.truncf %21 : vector<8x8xf32> to vector<8x8xbf16>
    %cst_8 = arith.constant dense<0.000000e+00> : vector<8x8xf32>
    %23 = tpu.matmul %20, %22, %cst_8 {dimension_numbers = #tpu.dot_dimension_numbers<[1], [1], [0], [0], [0, 0, 1, 0], [], []>} : vector<8x8xbf16>, vector<8x8xbf16>, vector<8x8xf32> -> vector<8x8xf32>
    %24 = vector.extract_strided_slice %18 {offsets = [0, 8], sizes = [8, 8], strides = [1, 1]} : vector<8x96xf32> to vector<8x8xf32>
    %25 = arith.truncf %24 : vector<8x8xf32> to vector<8x8xbf16>
    %26 = vector.extract_strided_slice %18 {offsets = [0, 40], sizes = [8, 8], strides = [1, 1]} : vector<8x96xf32> to vector<8x8xf32>
    %27 = arith.truncf %26 : vector<8x8xf32> to vector<8x8xbf16>
    %cst_9 = arith.constant dense<0.000000e+00> : vector<8x8xf32>
    %28 = tpu.matmul %25, %27, %cst_9 {dimension_numbers = #tpu.dot_dimension_numbers<[1], [1], [0], [0], [0, 0, 1, 0], [], []>} : vector<8x8xbf16>, vector<8x8xbf16>, vector<8x8xf32> -> vector<8x8xf32>
    %29 = vector.extract_strided_slice %18 {offsets = [0, 16], sizes = [8, 8], strides = [1, 1]} : vector<8x96xf32> to vector<8x8xf32>
    %30 = arith.truncf %29 : vector<8x8xf32> to vector<8x8xbf16>
    %31 = vector.extract_strided_slice %18 {offsets = [0, 48], sizes = [8, 8], strides = [1, 1]} : vector<8x96xf32> to vector<8x8xf32>
    %32 = arith.truncf %31 : vector<8x8xf32> to vector<8x8xbf16>
    %cst_10 = arith.constant dense<0.000000e+00> : vector<8x8xf32>
    %33 = tpu.matmul %30, %32, %cst_10 {dimension_numbers = #tpu.dot_dimension_numbers<[1], [1], [0], [0], [0, 0, 1, 0], [], []>} : vector<8x8xbf16>, vector<8x8xbf16>, vector<8x8xf32> -> vector<8x8xf32>
    %34 = vector.extract_strided_slice %18 {offsets = [0, 24], sizes = [8, 8], strides = [1, 1]} : vector<8x96xf32> to vector<8x8xf32>
    %35 = arith.truncf %34 : vector<8x8xf32> to vector<8x8xbf16>
    %36 = vector.extract_strided_slice %18 {offsets = [0, 56], sizes = [8, 8], strides = [1, 1]} : vector<8x96xf32> to vector<8x8xf32>
    %37 = arith.truncf %36 : vector<8x8xf32> to vector<8x8xbf16>
    %cst_11 = arith.constant dense<0.000000e+00> : vector<8x8xf32>
    %38 = tpu.matmul %35, %37, %cst_11 {dimension_numbers = #tpu.dot_dimension_numbers<[1], [1], [0], [0], [0, 0, 1, 0], [], []>} : vector<8x8xbf16>, vector<8x8xbf16>, vector<8x8xf32> -> vector<8x8xf32>
    %39 = vector.shape_cast %23 : vector<8x8xf32> to vector<1x8x8xf32>
    %40 = vector.shape_cast %28 : vector<8x8xf32> to vector<1x8x8xf32>
    %41 = vector.shape_cast %33 : vector<8x8xf32> to vector<1x8x8xf32>
    %42 = vector.shape_cast %38 : vector<8x8xf32> to vector<1x8x8xf32>
    %43 = tpu.concatenate %39, %40, %41, %42 in 0 : vector<1x8x8xf32>, vector<1x8x8xf32>, vector<1x8x8xf32>, vector<1x8x8xf32> -> vector<4x8x8xf32>
    %cst_12 = arith.constant dense<0xFF800000> : vector<4x8xf32>
    %44 = vector.multi_reduction <maximumf>, %43, %cst_12 [2] : vector<4x8x8xf32> to vector<4x8xf32>
    %45 = vector.shape_cast %44 : vector<4x8xf32> to vector<4x8x1xf32>
    %46 = vector.broadcast %45 : vector<4x8x1xf32> to vector<4x8x8xf32>
    %47 = arith.subf %43, %46 : vector<4x8x8xf32>
    %48 = math.exp %47 : vector<4x8x8xf32>
    %cst_13 = arith.constant dense<0.000000e+00> : vector<4x8xf32>
    %49 = vector.multi_reduction <add>, %48, %cst_13 [2] : vector<4x8x8xf32> to vector<4x8xf32>
    %50 = vector.shape_cast %49 : vector<4x8xf32> to vector<4x8x1xf32>
    %51 = tpu.reciprocal %50 {approx = true} : vector<4x8x1xf32> -> vector<4x8x1xf32>
    %52 = vector.broadcast %51 : vector<4x8x1xf32> to vector<4x8x8xf32>
    %53 = arith.mulf %48, %52 : vector<4x8x8xf32>
    %cst_14 = arith.constant 0.000000e+00 : f32
    %54 = vector.broadcast %cst_14 : f32 to vector<8x32xf32>
    %55 = vector.extract_strided_slice %18 {offsets = [0, 64], sizes = [8, 8], strides = [1, 1]} : vector<8x96xf32> to vector<8x8xf32>
    %56 = arith.truncf %55 : vector<8x8xf32> to vector<8x8xbf16>
    %57 = vector.extract_strided_slice %53 {offsets = [0, 0, 0], sizes = [1, 8, 8], strides = [1, 1, 1]} : vector<4x8x8xf32> to vector<1x8x8xf32>
    %58 = vector.shape_cast %57 : vector<1x8x8xf32> to vector<8x8xf32>
    %59 = arith.truncf %58 : vector<8x8xf32> to vector<8x8xbf16>
    %cst_15 = arith.constant dense<0.000000e+00> : vector<8x8xf32>
    %60 = tpu.matmul %59, %56, %cst_15 {dimension_numbers = #tpu.dot_dimension_numbers<[1], [0], [0], [1], [0, 0, 1, 1], [], []>} : vector<8x8xbf16>, vector<8x8xbf16>, vector<8x8xf32> -> vector<8x8xf32>
    %61 = arith.truncf %60 : vector<8x8xf32> to vector<8x8xbf16>
    %c0_16 = arith.constant 0 : index
    %c0_17 = arith.constant 0 : index
    %c0_18 = arith.constant 0 : index
    %62 = vector.load %arg4[%c0_16, %c0_17, %c0_18] : memref<4x8x32xbf16, #tpu.memory_space<vmem>>, vector<1x8x32xbf16>
    %63 = vector.shape_cast %62 : vector<1x8x32xbf16> to vector<8x32xbf16>
    %cst_19 = arith.constant dense<0.000000e+00> : vector<8x32xf32>
    %64 = tpu.matmul %61, %63, %cst_19 {dimension_numbers = #tpu.dot_dimension_numbers<[1], [0], [0], [1], [0, 0, 1, 1], [], []>} : vector<8x8xbf16>, vector<8x32xbf16>, vector<8x32xf32> -> vector<8x32xf32>
    %65 = arith.addf %54, %64 : vector<8x32xf32>
    %66 = vector.extract_strided_slice %18 {offsets = [0, 72], sizes = [8, 8], strides = [1, 1]} : vector<8x96xf32> to vector<8x8xf32>
    %67 = arith.truncf %66 : vector<8x8xf32> to vector<8x8xbf16>
    %68 = vector.extract_strided_slice %53 {offsets = [1, 0, 0], sizes = [1, 8, 8], strides = [1, 1, 1]} : vector<4x8x8xf32> to vector<1x8x8xf32>
    %69 = vector.shape_cast %68 : vector<1x8x8xf32> to vector<8x8xf32>
    %70 = arith.truncf %69 : vector<8x8xf32> to vector<8x8xbf16>
    %cst_20 = arith.constant dense<0.000000e+00> : vector<8x8xf32>
    %71 = tpu.matmul %70, %67, %cst_20 {dimension_numbers = #tpu.dot_dimension_numbers<[1], [0], [0], [1], [0, 0, 1, 1], [], []>} : vector<8x8xbf16>, vector<8x8xbf16>, vector<8x8xf32> -> vector<8x8xf32>
    %72 = arith.truncf %71 : vector<8x8xf32> to vector<8x8xbf16>
    %c1 = arith.constant 1 : index
    %c0_21 = arith.constant 0 : index
    %c0_22 = arith.constant 0 : index
    %73 = vector.load %arg4[%c1, %c0_21, %c0_22] : memref<4x8x32xbf16, #tpu.memory_space<vmem>>, vector<1x8x32xbf16>
    %74 = vector.shape_cast %73 : vector<1x8x32xbf16> to vector<8x32xbf16>
    %cst_23 = arith.constant dense<0.000000e+00> : vector<8x32xf32>
    %75 = tpu.matmul %72, %74, %cst_23 {dimension_numbers = #tpu.dot_dimension_numbers<[1], [0], [0], [1], [0, 0, 1, 1], [], []>} : vector<8x8xbf16>, vector<8x32xbf16>, vector<8x32xf32> -> vector<8x32xf32>
    %76 = arith.addf %65, %75 : vector<8x32xf32>
    %77 = vector.extract_strided_slice %18 {offsets = [0, 80], sizes = [8, 8], strides = [1, 1]} : vector<8x96xf32> to vector<8x8xf32>
    %78 = arith.truncf %77 : vector<8x8xf32> to vector<8x8xbf16>
    %79 = vector.extract_strided_slice %53 {offsets = [2, 0, 0], sizes = [1, 8, 8], strides = [1, 1, 1]} : vector<4x8x8xf32> to vector<1x8x8xf32>
    %80 = vector.shape_cast %79 : vector<1x8x8xf32> to vector<8x8xf32>
    %81 = arith.truncf %80 : vector<8x8xf32> to vector<8x8xbf16>
    %cst_24 = arith.constant dense<0.000000e+00> : vector<8x8xf32>
    %82 = tpu.matmul %81, %78, %cst_24 {dimension_numbers = #tpu.dot_dimension_numbers<[1], [0], [0], [1], [0, 0, 1, 1], [], []>} : vector<8x8xbf16>, vector<8x8xbf16>, vector<8x8xf32> -> vector<8x8xf32>
    %83 = arith.truncf %82 : vector<8x8xf32> to vector<8x8xbf16>
    %c2 = arith.constant 2 : index
    %c0_25 = arith.constant 0 : index
    %c0_26 = arith.constant 0 : index
    %84 = vector.load %arg4[%c2, %c0_25, %c0_26] : memref<4x8x32xbf16, #tpu.memory_space<vmem>>, vector<1x8x32xbf16>
    %85 = vector.shape_cast %84 : vector<1x8x32xbf16> to vector<8x32xbf16>
    %cst_27 = arith.constant dense<0.000000e+00> : vector<8x32xf32>
    %86 = tpu.matmul %83, %85, %cst_27 {dimension_numbers = #tpu.dot_dimension_numbers<[1], [0], [0], [1], [0, 0, 1, 1], [], []>} : vector<8x8xbf16>, vector<8x32xbf16>, vector<8x32xf32> -> vector<8x32xf32>
    %87 = arith.addf %76, %86 : vector<8x32xf32>
    %88 = vector.extract_strided_slice %18 {offsets = [0, 88], sizes = [8, 8], strides = [1, 1]} : vector<8x96xf32> to vector<8x8xf32>
    %89 = arith.truncf %88 : vector<8x8xf32> to vector<8x8xbf16>
    %90 = vector.extract_strided_slice %53 {offsets = [3, 0, 0], sizes = [1, 8, 8], strides = [1, 1, 1]} : vector<4x8x8xf32> to vector<1x8x8xf32>
    %91 = vector.shape_cast %90 : vector<1x8x8xf32> to vector<8x8xf32>
    %92 = arith.truncf %91 : vector<8x8xf32> to vector<8x8xbf16>
    %cst_28 = arith.constant dense<0.000000e+00> : vector<8x8xf32>
    %93 = tpu.matmul %92, %89, %cst_28 {dimension_numbers = #tpu.dot_dimension_numbers<[1], [0], [0], [1], [0, 0, 1, 1], [], []>} : vector<8x8xbf16>, vector<8x8xbf16>, vector<8x8xf32> -> vector<8x8xf32>
    %94 = arith.truncf %93 : vector<8x8xf32> to vector<8x8xbf16>
    %c3 = arith.constant 3 : index
    %c0_29 = arith.constant 0 : index
    %c0_30 = arith.constant 0 : index
    %95 = vector.load %arg4[%c3, %c0_29, %c0_30] : memref<4x8x32xbf16, #tpu.memory_space<vmem>>, vector<1x8x32xbf16>
    %96 = vector.shape_cast %95 : vector<1x8x32xbf16> to vector<8x32xbf16>
    %cst_31 = arith.constant dense<0.000000e+00> : vector<8x32xf32>
    %97 = tpu.matmul %94, %96, %cst_31 {dimension_numbers = #tpu.dot_dimension_numbers<[1], [0], [0], [1], [0, 0, 1, 1], [], []>} : vector<8x8xbf16>, vector<8x32xbf16>, vector<8x32xf32> -> vector<8x32xf32>
    %98 = arith.addf %87, %97 : vector<8x32xf32>
    %99 = vector.broadcast %2 : vector<1x32xf32> to vector<8x32xf32>
    %100 = arith.addf %98, %99 : vector<8x32xf32>
    %101 = arith.addf %13, %100 : vector<8x32xf32>
    %cst_32 = arith.constant dense<0.000000e+00> : vector<8xf32>
    %102 = vector.multi_reduction <add>, %101, %cst_32 [1] : vector<8x32xf32> to vector<8xf32>
    %103 = vector.shape_cast %102 : vector<8xf32> to vector<8x1xf32>
    %cst_33 = arith.constant 3.200000e+01 : f32
    %104 = vector.broadcast %cst_33 : f32 to vector<8x1xf32>
    %105 = arith.divf %103, %104 : vector<8x1xf32>
    %106 = vector.broadcast %105 : vector<8x1xf32> to vector<8x32xf32>
    %107 = arith.subf %101, %106 : vector<8x32xf32>
    %108 = arith.mulf %107, %107 : vector<8x32xf32>
    %cst_34 = arith.constant dense<0.000000e+00> : vector<8xf32>
    %109 = vector.multi_reduction <add>, %108, %cst_34 [1] : vector<8x32xf32> to vector<8xf32>
    %110 = vector.shape_cast %109 : vector<8xf32> to vector<8x1xf32>
    %cst_35 = arith.constant 3.200000e+01 : f32
    %111 = vector.broadcast %cst_35 : f32 to vector<8x1xf32>
    %112 = arith.divf %110, %111 : vector<8x1xf32>
    %113 = vector.broadcast %105 : vector<8x1xf32> to vector<8x32xf32>
    %114 = arith.subf %101, %113 : vector<8x32xf32>
    %cst_36 = arith.constant 9.99999974E-6 : f32
    %115 = vector.broadcast %cst_36 : f32 to vector<8x1xf32>
    %116 = arith.addf %112, %115 : vector<8x1xf32>
    %117 = math.rsqrt %116 : vector<8x1xf32>
    %118 = vector.broadcast %117 : vector<8x1xf32> to vector<8x32xf32>
    %119 = arith.mulf %114, %118 : vector<8x32xf32>
    %120 = vector.broadcast %3 : vector<1x32xf32> to vector<8x32xf32>
    %121 = arith.mulf %119, %120 : vector<8x32xf32>
    %122 = vector.broadcast %4 : vector<1x32xf32> to vector<8x32xf32>
    %123 = arith.addf %121, %122 : vector<8x32xf32>
    %124 = arith.truncf %123 : vector<8x32xf32> to vector<8x32xbf16>
    %c0_37 = arith.constant 0 : index
    %c0_38 = arith.constant 0 : index
    %125 = vector.load %arg5[%c0_37, %c0_38] : memref<32x64xbf16, #tpu.memory_space<vmem>>, vector<32x64xbf16>
    %cst_39 = arith.constant dense<0.000000e+00> : vector<8x64xf32>
    %126 = tpu.matmul %124, %125, %cst_39 {dimension_numbers = #tpu.dot_dimension_numbers<[1], [0], [0], [1], [0, 0, 1, 1], [], []>} : vector<8x32xbf16>, vector<32x64xbf16>, vector<8x64xf32> -> vector<8x64xf32>
    %127 = vector.broadcast %5 : vector<1x64xf32> to vector<8x64xf32>
    %128 = arith.addf %126, %127 : vector<8x64xf32>
    %cst_40 = arith.constant 5.000000e-01 : f32
    %129 = vector.broadcast %cst_40 : f32 to vector<8x64xf32>
    %130 = arith.mulf %129, %128 : vector<8x64xf32>
    %cst_41 = arith.constant 4.471500e-02 : f32
    %131 = vector.broadcast %cst_41 : f32 to vector<8x64xf32>
    %132 = arith.mulf %131, %128 : vector<8x64xf32>
    %133 = arith.mulf %132, %128 : vector<8x64xf32>
    %134 = arith.mulf %133, %128 : vector<8x64xf32>
    %135 = arith.addf %128, %134 : vector<8x64xf32>
    %cst_42 = arith.constant 0.797884583 : f32
    %136 = vector.broadcast %cst_42 : f32 to vector<8x64xf32>
    %137 = arith.mulf %136, %135 : vector<8x64xf32>
    %138 = math.tanh %137 : vector<8x64xf32>
    %cst_43 = arith.constant 1.000000e+00 : f32
    %139 = vector.broadcast %cst_43 : f32 to vector<8x64xf32>
    %140 = arith.addf %139, %138 : vector<8x64xf32>
    %141 = arith.mulf %130, %140 : vector<8x64xf32>
    %142 = arith.truncf %141 : vector<8x64xf32> to vector<8x64xbf16>
    %c0_44 = arith.constant 0 : index
    %c0_45 = arith.constant 0 : index
    %143 = vector.load %arg6[%c0_44, %c0_45] : memref<64x32xbf16, #tpu.memory_space<vmem>>, vector<64x32xbf16>
    %cst_46 = arith.constant dense<0.000000e+00> : vector<8x32xf32>
    %144 = tpu.matmul %142, %143, %cst_46 {dimension_numbers = #tpu.dot_dimension_numbers<[1], [0], [0], [1], [0, 0, 1, 1], [], []>} : vector<8x64xbf16>, vector<64x32xbf16>, vector<8x32xf32> -> vector<8x32xf32>
    %145 = vector.broadcast %6 : vector<1x32xf32> to vector<8x32xf32>
    %146 = arith.addf %144, %145 : vector<8x32xf32>
    %147 = arith.addf %123, %146 : vector<8x32xf32>
    %cst_47 = arith.constant dense<0.000000e+00> : vector<8xf32>
    %148 = vector.multi_reduction <add>, %147, %cst_47 [1] : vector<8x32xf32> to vector<8xf32>
    %149 = vector.shape_cast %148 : vector<8xf32> to vector<8x1xf32>
    %cst_48 = arith.constant 3.200000e+01 : f32
    %150 = vector.broadcast %cst_48 : f32 to vector<8x1xf32>
    %151 = arith.divf %149, %150 : vector<8x1xf32>
    %152 = vector.broadcast %151 : vector<8x1xf32> to vector<8x32xf32>
    %153 = arith.subf %147, %152 : vector<8x32xf32>
    %154 = arith.mulf %153, %153 : vector<8x32xf32>
    %cst_49 = arith.constant dense<0.000000e+00> : vector<8xf32>
    %155 = vector.multi_reduction <add>, %154, %cst_49 [1] : vector<8x32xf32> to vector<8xf32>
    %156 = vector.shape_cast %155 : vector<8xf32> to vector<8x1xf32>
    %cst_50 = arith.constant 3.200000e+01 : f32
    %157 = vector.broadcast %cst_50 : f32 to vector<8x1xf32>
    %158 = arith.divf %156, %157 : vector<8x1xf32>
    %159 = vector.broadcast %151 : vector<8x1xf32> to vector<8x32xf32>
    %160 = arith.subf %147, %159 : vector<8x32xf32>
    %cst_51 = arith.constant 9.99999974E-6 : f32
    %161 = vector.broadcast %cst_51 : f32 to vector<8x1xf32>
    %162 = arith.addf %158, %161 : vector<8x1xf32>
    %163 = math.rsqrt %162 : vector<8x1xf32>
    %164 = vector.broadcast %163 : vector<8x1xf32> to vector<8x32xf32>
    %165 = arith.mulf %160, %164 : vector<8x32xf32>
    %166 = vector.broadcast %7 : vector<1x32xf32> to vector<8x32xf32>
    %167 = arith.mulf %165, %166 : vector<8x32xf32>
    %168 = vector.broadcast %8 : vector<1x32xf32> to vector<8x32xf32>
    %169 = arith.addf %167, %168 : vector<8x32xf32>
    %170 = vector.shape_cast %169 : vector<8x32xf32> to vector<1x8x32xf32>
    %c0_52 = arith.constant 0 : index
    %c0_53 = arith.constant 0 : index
    %c0_54 = arith.constant 0 : index
    %171 = vector.load %arg8[%c0_52, %c0_53, %c0_54] : memref<1x8x32xf32, #tpu.memory_space<vmem>>, vector<1x8x32xf32>
    tpu.vector_store %arg8[%c0_52, %c0_53, %c0_54], %170 {strides = array<i32>} : memref<1x8x32xf32, #tpu.memory_space<vmem>>, vector<1x8x32xf32>,
    return
  }
  func.func @transform_0(%arg0: i32) -> (i32, i32, i32) {
    %c0_i32 = arith.constant 0 : i32
    %c0_i32_0 = arith.constant 0 : i32
    %c0_i32_1 = arith.constant 0 : i32
    return %arg0, %c0_i32, %c0_i32_0 : i32, i32, i32
  }
  func.func @transform_1(%arg0: i32) -> (i32, i32) {
    %c0_i32 = arith.constant 0 : i32
    %c0_i32_0 = arith.constant 0 : i32
    %c0_i32_1 = arith.constant 0 : i32
    return %c0_i32, %c0_i32_0 : i32, i32
  }
  func.func @transform_2(%arg0: i32) -> (i32, i32) {
    %c0_i32 = arith.constant 0 : i32
    %c0_i32_0 = arith.constant 0 : i32
    %c0_i32_1 = arith.constant 0 : i32
    return %c0_i32, %c0_i32_0 : i32, i32
  }
  func.func @transform_3(%arg0: i32) -> (i32, i32, i32) {
    %c0_i32 = arith.constant 0 : i32
    %c0_i32_0 = arith.constant 0 : i32
    %c0_i32_1 = arith.constant 0 : i32
    %c0_i32_2 = arith.constant 0 : i32
    return %c0_i32, %c0_i32_0, %c0_i32_1 : i32, i32, i32
  }
  func.func @transform_4(%arg0: i32) -> (i32, i32) {
    %c0_i32 = arith.constant 0 : i32
    %c0_i32_0 = arith.constant 0 : i32
    %c0_i32_1 = arith.constant 0 : i32
    return %c0_i32, %c0_i32_0 : i32, i32
  }
  func.func @transform_5(%arg0: i32) -> (i32, i32) {
    %c0_i32 = arith.constant 0 : i32
    %c0_i32_0 = arith.constant 0 : i32
    %c0_i32_1 = arith.constant 0 : i32
    return %c0_i32, %c0_i32_0 : i32, i32
  }
  func.func @transform_6(%arg0: i32) -> (i32, i32) {
    %c0_i32 = arith.constant 0 : i32
    %c0_i32_0 = arith.constant 0 : i32
    %c0_i32_1 = arith.constant 0 : i32
    return %c0_i32, %c0_i32_0 : i32, i32
  }
  func.func @transform_7(%arg0: i32) -> (i32, i32, i32) {
    %c0_i32 = arith.constant 0 : i32
    %c0_i32_0 = arith.constant 0 : i32
    %c0_i32_1 = arith.constant 0 : i32
    return %arg0, %c0_i32, %c0_i32_0 : i32, i32, i32
  }
}

</mosaic_0001>

<bundles_post_ra>
// kernel: tpu_custom_call.1
= control target key start
LH: loop header
LB: loop body
LE: loop exit
PB: predicated region body
PF: predicated region fallthrough
CT: control target
= control target key end

     0   :  { %12 = vsyncpa [#allocation3], 0  ;;  %s2205_s0 = inlined_call_operand.vmem [shape: f32[2,8,32], index: 0, kind: input, shape index: {}]   ;;  %s2206_s1 = inlined_call_operand.hbm [shape: f32[8,32], index: 1, kind: input, shape index: {}]   ;;  %s2207_s2 = inlined_call_operand.vmem [shape: bf16[32,96], index: 2, kind: input, shape index: {}]   ;;  %s2208_s3 = inlined_call_operand.vmem [shape: bf16[4,8,32], index: 3, kind: input, shape index: {}]   ;;  %s2209_s4 = inlined_call_operand.hbm [shape: bf16[32,64], index: 4, kind: input, shape index: {}]   ;;  %s2210_s5 = inlined_call_operand.vmem [shape: bf16[64,32], index: 5, kind: input, shape index: {}]   ;;  %s2211_s6 = inlined_call_operand.hbm [shape: f32[8,128], index: 6, kind: input, shape index: {}]   ;;  %s2212_s7 = inlined_call_operand.hbm [shape: f32[2,8,32], index: 7, kind: output, shape index: {}]  }
   0x1   :  { %13 = vsyncpa [#allocation6], 0 }
   0x2   :  { %14 = vsyncpa [#allocation4], 0 }
   0x3   :  { %16 = vsyncpa [#allocation4 + $0x1], 0  ;;  %s1843_s24 = smov 0   ;;  %s1845_s25 = smov 0  }
   0x4   :  { %s1847_s26 = smov 0   ;;  %s1849_s27 = smov 0  }
   0x5 LB: > { %2219 = sst [smem:[#allocation12_spill]] %s1778_s26  ;;  %s1864_s28 = sadd.s32 4294967295, %s1782_s27   ;;  %s1782_s27 = sphi %s1849_s27, %s2234_s27   ;;  %s1778_s26 = sphi %s1847_s26, %s2239_s26   ;;  %s1774_s25 = sphi %s1845_s25, %s2238_s25   ;;  %s1770_s24 = sphi %s1843_s24, %s2237_s24  }
   0x6   : > { %s1336_s29 = sadd.s32 4294967294, %s1782_s27   ;;  %s1868_s30 = sadd.s32 1, %s1782_s27  }
   0x7   : > { %2220 = sst [smem:[#allocation13_spill]] %s1868_s30  ;;  %s181_s8 = sadd.s32 1, %s1778_s26 }
   0x8   : > { %s178_s9 = ssub.s32 %s1782_s27, %s1868_s30  ;;  %p191_p0 = scmp.ne.s32.totalorder %s1778_s26, %s1774_s25 }
   0x9   : > { %p179_p1 = scmp.eq.s32.totalorder %s178_s9, 0  ;;  %p192_p2 = scmp.eq.s32.totalorder %s1864_s28, 1 }
   0xa   : > { %p197_p3 = scmp.ne.s32.totalorder %s1774_s25, %s1770_s24  ;;  %p198_p4 = scmp.eq.s32.totalorder %s1336_s29, 1 }
   0xb   : > { %s1879_s10 = scalar_select %p179_p1, %s1778_s26, %s181_s8  }
   0xc   : > { %p1881_p5 = por %p192_p2, %p191_p0  ;;  %p1885_p6 = por %p198_p4, %p197_p3 }
   0xd   : > { %2221 = sst [smem:[#allocation14_spill]] %s1879_s10  ;;  %p1337_p7 = scmp.ge.s32.totalorder %s1782_s27, 1 }
   0xe   : > { %s2222_s11 = scalar_select %p1881_p5, 1, 0 }
   0xf   : > { %s2223_s12 = scalar_select %p1885_p6, 1, 0 }
  0x10   : > { %p205_p8 = scmp.lt.s32.totalorder %s1782_s27, 3  ;;  %p2213_p9 = scmp.eq.s32.totalorder %s1864_s28, 0 }
  0x11   : > { %s1784_s14 = smov [#allocation5]   ;;  %s1785_s17 = smov [#allocation2]  }
  0x12   : > { %p1892_p10 = pnand %p1337_p7, %p205_p8  ;;  %s234_s15 = sshll.u32 %s1784_s14, 4  ;;  %s1898_s15 = int_to_ptr.vmem [resolvable:$true] %s234_s15 }
  0x13   : > { %s218_s18 = sshll.u32 %s1785_s17, 4  ;;  %s1786_s19 = smov [#allocation7]   ;;  %s1906_s18 = int_to_ptr.vmem [resolvable:$true] %s218_s18 }
  0x14   : > { %s2224_s13 = scalar_select %p1892_p10, 1, 0 }
  0x15   : > { %p1527_p11 = pneg %p1892_p10  ;;  %s1908_s20 = sshll.u32 %s1786_s19, 4  ;;  %s252_s20 = int_to_ptr.vmem [resolvable:$true] %s1908_s20 }
  0x16   : > { %s1628_s23 = scalar_lea.hbm %s2209_s4, 256 }
  0x17   : > { %p1902_p12 = pnand %p2213_p9, %p1527_p11  ;;  %p1629_p13 = scmp.ne.s32.totalorder %s2209_s4, %s1628_s23 }
  0x18   : > { %p1635_p3 = scmp.lt.u32.totalorder %s1628_s23, %s2209_s4 }
  0x19   : > { %p1918_p0 = pneg %p1902_p12 }
  0x1b   : > { %p1631_p1 = pnand %p1918_p0, %p1629_p13 }
  0x1d   : > { %p1632_p2 = pneg %p1631_p1 }
  0x1f   : > { %p1637_p4 = pnand %p1635_p3, %p1632_p2 }
  0x21   : > { %1640 = shalt.err (!%p1637_p4)
}
  0x22   : > { %s1641_s19 = scalar_lea.vmem %s1898_s15, 256  ;;  %p1649_p9 = scmp.lt.s32.totalorder %s1898_s15, %s1898_s15 }
  0x23   : > { %p1642_p7 = scmp.ne.s32.totalorder %s1898_s15, %s1641_s19  ;;  %p1650_p6 = scmp.lt.s32.totalorder %s1641_s19, %s1641_s19 }
  0x25   : > { %p1644_p8 = pnand %p1642_p7, %p1918_p0  ;;  %p1651_p13 = por %p1650_p6, %p1649_p9 }
  0x27   : > { %p1645_p11 = pneg %p1644_p8 }
  0x29   : > { %p1652_p1 = pnand %p1651_p13, %p1645_p11 }
  0x2b   : > { %1655 = shalt.err (!%p1652_p1)
}
  0x2c   : > { %s1787_s21 = smov 64   ;;  %s1788_s22 = smov 4  }
  0x2d   : > { %1533 = dma.hbm_to_vmem [thread:$0]  (!%p1902_p12), %s2209_s4, 256, %s1898_s15, [#allocation6], %s1787_s21, %s1787_s21, %s1788_s22  }
  0x2e   : > { %s1656_s17 = scalar_lea.hbm %s2206_s1, 128 }
  0x2f   : > { %p1657_p6 = scmp.ne.s32.totalorder %s2206_s1, %s1656_s17  ;;  %p1663_p3 = scmp.lt.u32.totalorder %s1656_s17, %s2206_s1 }
  0x31   : > { %p1659_p9 = pnand %p1657_p6, %p1918_p0 }
  0x33   : > { %p1660_p2 = pneg %p1659_p9 }
  0x35   : > { %p1665_p4 = pnand %p1663_p3, %p1660_p2 }
  0x37   : > { %1668 = shalt.err (!%p1665_p4)
}
  0x38   : > { %s1669_s15 = scalar_lea.vmem %s1906_s18, 128  ;;  %p1677_p13 = scmp.lt.s32.totalorder %s1906_s18, %s1906_s18 }
  0x39   : > { %p1670_p7 = scmp.ne.s32.totalorder %s1906_s18, %s1669_s15  ;;  %p1678_p1 = scmp.lt.s32.totalorder %s1669_s15, %s1669_s15 }
  0x3b   : > { %p1672_p8 = pnand %p1670_p7, %p1918_p0  ;;  %p1679_p6 = por %p1678_p1, %p1677_p13 }
  0x3d   : > { %p1673_p11 = pneg %p1672_p8 }
  0x3f   : > { %p1680_p9 = pnand %p1679_p6, %p1673_p11 }
  0x41   : > { %1683 = shalt.err (!%p1680_p9)
}
  0x42   : > { %1530 = dma.hbm_to_vmem [thread:$0]  (!%p1902_p12), %s2206_s1, 128, %s1906_s18, [#allocation3]  }
  0x43   : > { %s1684_s22 = scalar_lea.hbm %s2211_s6, 128 }
  0x44   : > { %p1685_p2 = scmp.ne.s32.totalorder %s2211_s6, %s1684_s22  ;;  %p1691_p7 = scmp.lt.u32.totalorder %s1684_s22, %s2211_s6 }
  0x46   : > { %p1687_p3 = pnand %p1685_p2, %p1918_p0 }
  0x48   : > { %p1688_p4 = pneg %p1687_p3 }
  0x4a   : > { %p1693_p8 = pnand %p1691_p7, %p1688_p4 }
  0x4c   : > { %1696 = shalt.err (!%p1693_p8)
}
  0x4d   : > { %s1697_s17 = scalar_lea.vmem %s252_s20, 128  ;;  %p1705_p6 = scmp.lt.s32.totalorder %s252_s20, %s252_s20 }
  0x4e   : > { %p1698_p11 = scmp.ne.s32.totalorder %s252_s20, %s1697_s17  ;;  %p1706_p9 = scmp.lt.s32.totalorder %s1697_s17, %s1697_s17 }
  0x50   : > { %p1700_p13 = pnand %p1698_p11, %p1918_p0  ;;  %p1707_p5 = por %p1706_p9, %p1705_p6 }
  0x52   : > { %p1701_p1 = pneg %p1700_p13 }
  0x54   : > { %p1708_p10 = pnand %p1707_p5, %p1701_p1 }
  0x56   : > { %1711 = shalt.err (!%p1708_p10)
}
  0x57   : > { %1536 = dma.hbm_to_vmem [thread:$0]  (!%p1902_p12), %s2211_s6, 128, %s252_s20, [#allocation6]  }
  0x58   : > { %p2227_p2 = scmp.ne.s32.totalorder %s2224_s13, 0 }
  0x59   : > { %p2228_p3 = scmp.eq.s32.totalorder (!%p2227_p2), %s1864_s28, 0 }
  0x5a   : > { %271 = sbr.rel (%p2227_p2) target bundleno = 2741 (0xab5), region = 48 }
  0x61   : > { %1757 = dma.done.wait (%p2228_p3), [#allocation3], 128   ;;  %p2229_p0 = pmov %p2228_p3 }
  0x63   : > { %1759 = vsyncadd (%p2229_p0), [#allocation3], 4294967168  ;;  %p2230_p4 = pmov %p2229_p0 }
  0x64   : > { %p2231_p5 = pmov %p2229_p0 }
  0x65   : > { %1761 = dma.done.wait (%p2230_p4), [#allocation6], 384  }
  0x66   : > { %1763 = vsyncadd (%p2231_p5), [#allocation6], 4294966912  ;;  %p310_p10 = scmp.lt.s32.totalorder %s1864_s28, 1  ;;  %v1789_v0 = vmov 0.0   ;;  %vm1790_vm0 = vmmov 0   ;;  %v1598_v1 = vld [vmem:[%s2207_s2] sm:$0xff]   ;;  %v324_v7 = vlaneseq }
  0x67   : > { %1413 = vmatprep.subr.bf16.mxu1 %v1789_v0  ;;  %1417 = vmatprep.mubr.msk.bf16.mxu1 %vm1790_vm0, %v1789_v0  ;;  %v1599_v2 = vld [vmem:[%s2207_s2 + $0x8] sm:$0xff]   ;;  %v317_v4 = vld [vmem:[#allocation2] sm:$0xff]  ;;  %vm340_vm1 = vcmask 261120   ;;  %v2020_v10 = vld [vmem:[#allocation7] sm:$0xff]  ;;  %s1791_s22 = smov 96   ;;  %s1792_s23 = smov 88  }
  0x68   : > { %s311_s13 = scalar_select %p310_p10, %s1864_s28, 1  ;;  %1427 = vmatprep.subr.bf16.mxu0 %v1789_v0  ;;  %1429 = vmatprep.mubr.msk.bf16.mxu0 %vm1790_vm0, %v1789_v0  ;;  %v2017_v8 = vshrl.u32 %v324_v7, 7  ;;  %vm388_vm2 = vcmask 64512   ;;  %vm635_vm3 = vcmask 1043456   ;;  %vm1163_vm4 = vcmask 523264  }
  0x69   : > { %1414 = vmatpush3.bf16.msra.mxu1 %v1598_v1  ;;  %s1793_s29 = smov 80   ;;  %s1794_s8 = smov 120  }
  0x6a   : > { %s1347_s16 = sshll.u32 %s311_s13, 3  ;;  %1415 = vmatprep.subr.bf16.mxu1 %v1789_v0  ;;  %v326_v9 = vsub.s32 0, %v2017_v8  ;;  %s1795_s14 = smov 72  }
  0x6b   : > { %s313_s15 = scalar_lea.vmem %s2205_s0, %s1347_s16  ;;  %s1796_s17 = smov 112  }
  0x6c   : > { %v316_v3 = vld [vmem:[%s313_s15] sm:$0xff]  ;;  %v327_v11 = vrot.slane %v2020_v10, %v326_v9  ;;  %s1797_s18 = smov 104   ;;  %s1798_s19 = smov 56  }
  0x6d   : > { %v2009_v5 = vadd.f32 %v317_v4, %v316_v3  ;;  %1416 = vmatpush3.bf16.msra.mxu1 %v1599_v2  ;;  %s1799_s13 = smov 64   ;;  %s1800_s16 = smov 48  }
  0x6e   : > { %1421 = vmatprep.subr.bf16.mxu1 %v1789_v0  ;;  %s1801_s20 = smov 40   ;;  %s1375_s15 = sshll.u32 %s1864_s28, 7 }
  0x6f   : > { %v319_v6 = vpack.c.bf16 %v2009_v5, %v2009_v5  ;;  %p2232_p7 = scmp.ne.s32.totalorder %s2222_s11, 0  ;;  %s1802_s28 = smov [#allocation8]  }
  0x71   : > { %1418 = vmatmul.mubr.msk.bf16.vlgmr.msra.gmra.mrb[0].mxu1 %vm340_vm1, %v319_v6 }
  0x72   : > { %1423 = vmatprep.mubr.msk.bf16.mxu1 %vm1790_vm0, %v1789_v0 }
 0x144   : > { %v378_v12 = vpop.f32.mrb[0].mxu1 }
 0x145   : > { %v379_v13 = vadd.f32 %v378_v12, %v327_v11  ;;  %v1419_v14 = vpop.f32.mrb[1].mxu1 }
 0x146   : > { %v381_v15 = vpop.f32.mrb[2].mxu1 }
 0x147   : > { %v2023_v16 = vpack.c.bf16 %v379_v13, %v379_v13  ;;  %v1420_v17 = vpop.f32.mrb[3].mxu1 }
 0x149   : > { %386 = vrot.lane.b32.xlu1 %v2023_v16, %s1791_s22  ;;  %437 = vrot.lane.b32.xlu0 %v2023_v16, %s1792_s23  ;;  %s2162_s22 = scalar_lea.hbm %s2212_s7, %s1375_s15 }
 0x14d   : > { %487 = vrot.lane.b32.xlu1 %v2023_v16, %s1793_s29  ;;  %435 = vrot.lane.b32.xlu0 %v2023_v16, %s1794_s8  ;;  %s1716_s8 = sshll.u32 %s1802_s28, 4  ;;  %s1717_s8 = int_to_ptr.vmem [resolvable:$false] %s1716_s8 }
 0x151   : > { %537 = vrot.lane.b32.xlu1 %v2023_v16, %s1795_s14  ;;  %485 = vrot.lane.b32.xlu0 %v2023_v16, %s1796_s17  ;;  %s1718_s14 = scalar_lea.vmem %s1717_s8, 256 }
 0x155   : > { %535 = vrot.lane.b32.xlu0 %v2023_v16, %s1797_s18 }
 0x1bb   : > { %v387_v18 = vpop.permute.xlu1 %386  ;;  %v438_v19 = vpop.permute.xlu0 %437 }
 0x1bc   : > { %v393_v20 = vsel %vm388_vm2, %v387_v18, 0  ;;  %v443_v21 = vsel %vm388_vm2, %v438_v19, 0  ;;  %v1357_v19 = vld [vmem:[%s2208_s3 + $0x4] sm:$0xf] }
 0x1bd   : > { %1422 = vmatpush3.bf16.xpose.msra.mxu1 %v393_v20  ;;  %1428 = vmatpush3.bf16.xpose.msra.mxu0 %v443_v21 }
 0x1be   : > { %1433 = vmatprep.subr.bf16.mxu1 %v1789_v0  ;;  %1439 = vmatprep.subr.bf16.mxu0 %v1789_v0 }
 0x1bf   : > { %v488_v22 = vpop.permute.xlu1 %487  ;;  %v436_v23 = vpop.permute.xlu0 %435 }
 0x1c0   : > { %v493_v25 = vsel %vm388_vm2, %v488_v22, 0  ;;  %v737_v22 = vsel %vm635_vm3, %v1357_v19, 0 }
 0x1c3   : > { %v538_v24 = vpop.permute.xlu1 %537  ;;  %v486_v27 = vpop.permute.xlu0 %485 }
 0x1c4   : > { %v543_v26 = vsel %vm388_vm2, %v538_v24, 0  ;;  %1424 = vmatmul.mubr.msk.bf16.vlgmr.msra.gmra.mrb[4].mxu1 %vm388_vm2, %v2023_v16  ;;  %1430 = vmatmul.mubr.msk.bf16.vlgmr.msra.gmra.mrb[0].mxu0 %vm388_vm2, %v436_v23  ;;  %v680_v23 = vld [vmem:[%s2208_s3] sm:$0xf] }
 0x1c5   : > { %1434 = vmatpush3.bf16.xpose.msra.mxu1 %v493_v25  ;;  %1440 = vmatpush3.bf16.xpose.msra.mxu0 %v543_v26  ;;  %v783_v24 = vsel %vm635_vm3, %v680_v23, 0 }
 0x1c6   : > { %1435 = vmatprep.mubr.msk.bf16.mxu1 %vm1790_vm0, %v1789_v0  ;;  %1441 = vmatprep.mubr.msk.bf16.mxu0 %vm1790_vm0, %v1789_v0 }
 0x1c7   : > { %1451 = vmatprep.subr.bf16.mxu0 %v1789_v0  ;;  %1445 = vmatprep.subr.bf16.mxu1 %v1789_v0  ;;  %v536_v28 = vpop.permute.xlu0 %535 }
 0x1cc   : > { %1436 = vmatmul.mubr.msk.bf16.vlgmr.msra.gmra.mrb[8].mxu1 %vm388_vm2, %v486_v27  ;;  %1442 = vmatmul.mubr.msk.bf16.vlgmr.msra.gmra.mrb[4].mxu0 %vm388_vm2, %v536_v28 }
 0x1cd   : > { %1453 = vmatprep.mubr.msk.bf16.mxu0 %vm1790_vm0, %v1789_v0  ;;  %1447 = vmatprep.mubr.msk.bf16.mxu1 %vm1790_vm0, %v1789_v0 }
 0x297   : > { %v429_v29 = vpop.f32.mrb[4].mxu1  ;;  %v479_v30 = vpop.f32.mrb[0].mxu0 }
 0x298   : > { %v1425_v31 = vpop.f32.mrb[5].mxu1  ;;  %v1431_v32 = vpop.f32.mrb[1].mxu0  ;;  %v588_v33 = vsel %vm388_vm2, %v479_v30, -inf  ;;  %v585_v38 = vsel %vm388_vm2, %v429_v29, -inf }
 0x299   : > { %v432_v34 = vpop.f32.mrb[6].mxu1  ;;  %589 = vmax.xlane.f32.xlu1 %v588_v33  ;;  %v482_v35 = vpop.f32.mrb[2].mxu0 }
 0x29a   : > { %v1426_v36 = vpop.f32.mrb[7].mxu1  ;;  %v1432_v37 = vpop.f32.mrb[3].mxu0 }
 0x29d   : > { %586 = vmax.xlane.f32.xlu1 %v585_v38 }
 0x29f   : > { %v529_v39 = vpop.f32.mrb[8].mxu1  ;;  %v579_v40 = vpop.f32.mrb[4].mxu0 }
 0x2a0   : > { %v1437_v41 = vpop.f32.mrb[9].mxu1  ;;  %v1443_v42 = vpop.f32.mrb[5].mxu0  ;;  %v591_v43 = vsel %vm388_vm2, %v529_v39, -inf  ;;  %v594_v48 = vsel %vm388_vm2, %v579_v40, -inf }
 0x2a1   : > { %592 = vmax.xlane.f32.xlu1 %v591_v43  ;;  %v532_v44 = vpop.f32.mrb[10].mxu1  ;;  %v582_v45 = vpop.f32.mrb[6].mxu0 }
 0x2a2   : > { %v1438_v46 = vpop.f32.mrb[11].mxu1  ;;  %v1444_v47 = vpop.f32.mrb[7].mxu0 }
 0x2a3   : > { %v1361_v47 = vld [vmem:[%s2208_s3 + $0x8] sm:$0xf] }
 0x2a5   : > { %595 = vmax.xlane.f32.xlu1 %v594_v48  ;;  %v881_v48 = vsel %vm635_vm3, %v1361_v47, 0  ;;  %v1060_v47 = vsub.s32 4, %v2017_v8 }
 0x326   : > { %v590_v49 = vpop.xlane.xlu1 %589 }
 0x327   : > { %v598_v50 = vsub.f32 %v479_v30, %v590_v49 }
 0x329   : > { %v603_v51 = vmul.f32 1.442695, %v598_v50 }
 0x32a   : > { %v587_v52 = vpop.xlane.xlu1 %586 }
 0x32b   : > { %1606 = vpow2.f32 %v603_v51  ;;  %v597_v53 = vsub.f32 %v429_v29, %v587_v52 }
 0x32d   : > { %v601_v54 = vmul.f32 1.442695, %v597_v53 }
 0x32e   : > { %v593_v55 = vpop.xlane.xlu1 %592 }
 0x32f   : > { %1608 = vpow2.f32 %v601_v54  ;;  %v599_v56 = vsub.f32 %v529_v39, %v593_v55 }
 0x331   : > { %v605_v57 = vmul.f32 1.442695, %v599_v56 }
 0x332   : > { %v596_v58 = vpop.xlane.xlu1 %595 }
 0x333   : > { %1610 = vpow2.f32 %v605_v57  ;;  %v600_v59 = vsub.f32 %v579_v40, %v596_v58  ;;  %v1364_v57 = vld [vmem:[%s2208_s3 + $0xc] sm:$0xf] }
 0x335   : > { %v1607_v60 = vpop.eup %1606  ;;  %v607_v61 = vmul.f32 1.442695, %v600_v59 }
 0x336   : > { %v612_v62 = vsel %vm388_vm2, %v1607_v60, 0.0 }
 0x337   : > { %1612 = vpow2.f32 %v607_v61  ;;  %613 = vadd.xlane.f32.xlu0 %v612_v62  ;;  %v980_v62 = vsel %vm635_vm3, %v1364_v57, 0 }
 0x339   : > { %v1609_v63 = vpop.eup %1608 }
 0x33a   : > { %v609_v1 = vsel %vm388_vm2, %v1609_v63, 0.0 }
 0x33b   : > { %610 = vadd.xlane.f32.xlu1 %v609_v1 }
 0x33d   : > { %v1611_v2 = vpop.eup %1610 }
 0x33e   : > { %v615_v3 = vsel %vm388_vm2, %v1611_v2, 0.0 }
 0x33f   : > { %616 = vadd.xlane.f32.xlu1 %v615_v3 }
 0x341   : > { %v2060_v4 = vpop.eup %1612 }
 0x342   : > { %v618_v6 = vsel %vm388_vm2, %v2060_v4, 0.0 }
 0x343   : > { %619 = vadd.xlane.f32.xlu1 %v618_v6 }
 0x34d   : > { %682 = vrot.lane.b32.xlu0 %v2023_v16, %s1798_s19 }
 0x351   : > { %630 = vrot.lane.b32.xlu0 %v2023_v16, %s1799_s13 }
 0x354   : > { %826 = vrot.lane.b32.xlu1 %v2023_v16, %s1800_s16 }
 0x355   : > { %925 = vrot.lane.b32.xlu0 %v2023_v16, %s1801_s20  ;;  %s307_s20 = sand.u32 1, %s1774_s25  }
 0x356   : > { %s1346_s9 = sshll.u32 %s307_s20, 3  ;;  %s1233_s23 = scalar_lea.sflag [#allocation4], %s307_s20 }
 0x357   : > { %s309_s26 = scalar_lea.vmem [#allocation8], %s1346_s9 }
 0x358   : > { %s1246_s30 = sshll.u32 %s309_s26, 4  ;;  %s2164_s30 = int_to_ptr.vmem [resolvable:$true] %s1246_s30 }
 0x359   : > { %s1712_s29 = scalar_lea.vmem %s2164_s30, 128  ;;  %p1719_p13 = scmp.lt.s32.totalorder %s2164_s30, %s1717_s8 }
 0x35a   : > { %p1713_p12 = scmp.ne.s32.totalorder %s2164_s30, %s1712_s29  ;;  %p1720_p1 = scmp.lt.s32.totalorder %s1718_s14, %s1712_s29 }
 0x35c   : > { %p1714_p8 = pnand %p1713_p12, %p2232_p7  ;;  %p1721_p6 = por %p1720_p1, %p1719_p13 }
 0x35e   : > { %p1715_p11 = pneg %p1714_p8 }
 0x360   : > { %p1722_p9 = pnand %p1721_p6, %p1715_p11 }
 0x3c4   : > { %v614_v7 = vpop.xlane.xlu0 %613 }
 0x3c5   : > { %1614 = vrcp.f32 %v614_v7 }
 0x3c8   : > { %v611_v9 = vpop.xlane.xlu1 %610  ;;  %v683_v11 = vpop.permute.xlu0 %682 }
 0x3c9   : > { %1616 = vrcp.f32 %v611_v9  ;;  %v688_v12 = vsel %vm635_vm3, %v683_v11, 0 }
 0x3ca   : > { %1452 = vmatpush3.bf16.msra.mxu0 %v688_v12 }
 0x3cb   : > { %1463 = vmatprep.subr.bf16.mxu0 %v1789_v0 }
 0x3cc   : > { %v631_v13 = vpop.permute.xlu0 %630  ;;  %v617_v25 = vpop.xlane.xlu1 %616 }
 0x3cd   : > { %v637_v14 = vsel %vm635_vm3, %v631_v13, 0  ;;  %1618 = vrcp.f32 %v617_v25 }
 0x3ce   : > { %1446 = vmatpush3.bf16.msra.mxu1 %v637_v14 }
 0x3cf   : > { %v1615_v15 = vpop.eup %1614  ;;  %1457 = vmatprep.subr.bf16.mxu1 %v1789_v0 }
 0x3d0   : > { %v626_v17 = vmul.f32 %v1615_v15, %v1607_v60  ;;  %v620_v26 = vpop.xlane.xlu1 %619  ;;  %v926_v41 = vpop.permute.xlu0 %925  ;;  %v1025_v15 = vsub.s32 1, %v2017_v8 }
 0x3d1   : > { %1620 = vrcp.f32 %v620_v26  ;;  %v931_v44 = vsel %vm635_vm3, %v926_v41, 0 }
 0x3d2   : > { %v681_v16 = vpack.c.bf16 %v626_v17, %v626_v17  ;;  %v1026_v17 = vrot.slane %v2020_v10, %v1025_v15 }
 0x3d3   : > { %v1617_v18 = vpop.eup %1616 }
 0x3d4   : > { %v625_v20 = vmul.f32 %v1617_v18, %v1609_v63  ;;  %1454 = vmatmul.mubr.msk.bf16.vlgmr.msra.gmra.mrb[8].mxu0 %vm388_vm2, %v681_v16  ;;  %v827_v27 = vpop.permute.xlu1 %826 }
 0x3d5   : > { %1465 = vmatprep.mubr.msk.bf16.mxu0 %vm1790_vm0, %v1789_v0  ;;  %1464 = vmatpush3.bf16.msra.mxu0 %v783_v24  ;;  %v832_v33 = vsel %vm635_vm3, %v827_v27, 0 }
 0x3d6   : > { %v629_v21 = vpack.c.bf16 %v625_v20, %v625_v20  ;;  %1475 = vmatprep.subr.bf16.mxu0 %v1789_v0 }
 0x3d7   : > { %v1619_v31 = vpop.eup %1618 }
 0x3d8   : > { %1448 = vmatmul.mubr.msk.bf16.vlgmr.msra.gmra.mrb[12].mxu1 %vm388_vm2, %v629_v21  ;;  %v627_v36 = vmul.f32 %v1619_v31, %v1611_v2  ;;  %v1601_v31 = vld [vmem:[#allocation5 + $0x8] sm:$0xff]  }
 0x3d9   : > { %1458 = vmatpush3.bf16.msra.mxu1 %v737_v22  ;;  %1459 = vmatprep.mubr.msk.bf16.mxu1 %vm1790_vm0, %v1789_v0 }
 0x3da   : > { %1469 = vmatprep.subr.bf16.mxu1 %v1789_v0  ;;  %v825_v42 = vpack.c.bf16 %v627_v36, %v627_v36 }
 0x3db   : > { %v1621_v43 = vpop.eup %1620 }
 0x3dc   : > { %v628_v45 = vmul.f32 %v1621_v43, %v2060_v4  ;;  %v1602_v43 = vld [vmem:[%s2210_s5] sm:$0xff]  }
 0x3de   : > { %v924_v46 = vpack.c.bf16 %v628_v45, %v628_v45  ;;  %v1604_v45 = vld [vmem:[%s2210_s5 + $0x10] sm:$0xff]  }
 0x4a7   : > { %v724_v28 = vpop.f32.mrb[8].mxu0 }
 0x4a8   : > { %v730_v29 = vpack.c.bf16 %v724_v28, %v724_v28  ;;  %v1455_v30 = vpop.f32.mrb[9].mxu0 }
 0x4a9   : > { %v727_v32 = vpop.f32.mrb[10].mxu0  ;;  %v1600_v30 = vld [vmem:[#allocation5] sm:$0xff]  }
 0x4aa   : > { %v1456_v34 = vpop.f32.mrb[11].mxu0  ;;  %1460 = vmatmul.mubr.msk.bf16.vlgmr.msra.gmra.mrb[16].mxu1 %vm388_vm2, %v730_v29 }
 0x4ab   : > { %1470 = vmatpush3.bf16.msra.mxu1 %v832_v33  ;;  %v673_v35 = vpop.f32.mrb[12].mxu1  ;;  %1471 = vmatprep.mubr.msk.bf16.mxu1 %vm1790_vm0, %v1789_v0 }
 0x4ac   : > { %v679_v37 = vpack.c.bf16 %v673_v35, %v673_v35  ;;  %v1449_v38 = vpop.f32.mrb[13].mxu1  ;;  %1481 = vmatprep.subr.bf16.mxu1 %v1789_v0  ;;  %v1050_v35 = vsub.s32 3, %v2017_v8 }
 0x4ad   : > { %v676_v39 = vpop.f32.mrb[14].mxu1 }
 0x4ae   : > { %v1450_v40 = vpop.f32.mrb[15].mxu1  ;;  %1466 = vmatmul.mubr.msk.bf16.vlgmr.msra.gmra.mrb[12].mxu0 %vm388_vm2, %v679_v37  ;;  %v1051_v39 = vrot.slane %v2020_v10, %v1050_v35 }
 0x4af   : > { %1477 = vmatprep.mubr.msk.bf16.mxu0 %vm1790_vm0, %v1789_v0  ;;  %1476 = vmatpush3.bf16.msra.mxu0 %v881_v48  ;;  %v1061_v48 = vrot.slane %v2020_v10, %v1060_v47 }
 0x4b0   : > { %1487 = vmatprep.subr.bf16.mxu0 %v1789_v0 }
 0x4b2   : > { %1472 = vmatmul.mubr.msk.bf16.vlgmr.msra.gmra.mrb[20].mxu1 %vm388_vm2, %v825_v42 }
 0x4b3   : > { %1482 = vmatpush3.bf16.msra.mxu1 %v931_v44  ;;  %1483 = vmatprep.mubr.msk.bf16.mxu1 %vm1790_vm0, %v1789_v0  ;;  %v1603_v44 = vld [vmem:[%s2210_s5 + $0x8] sm:$0xff]  }
 0x4b4   : > { %1493 = vmatprep.subr.bf16.mxu1 %v1789_v0 }
 0x4ba   : > { %1484 = vmatmul.mubr.msk.bf16.vlgmr.msra.gmra.mrb[24].mxu1 %vm388_vm2, %v924_v46  ;;  %v1605_v46 = vld [vmem:[%s2210_s5 + $0x18] sm:$0xff]  }
 0x4bb   : > { %1497 = vmatprep.mubr.msk.bf16.mxu1 %vm1790_vm0, %v1789_v0  ;;  %1494 = vmatpush3.bf16.msra.mxu1 %v1600_v30 }
 0x4bc   : > { %1495 = vmatprep.subr.bf16.mxu1 %v1789_v0 }
 0x4bf   : > { %1496 = vmatpush3.bf16.msra.mxu1 %v1601_v31 }
 0x57d   : > { %v773_v49 = vpop.f32.mrb[16].mxu1 }
 0x57e   : > { %v1461_v50 = vpop.f32.mrb[17].mxu1 }
 0x57f   : > { %v776_v51 = vpop.f32.mrb[18].mxu1 }
 0x580   : > { %v1462_v52 = vpop.f32.mrb[19].mxu1 }
 0x581   : > { %v819_v53 = vpop.f32.mrb[12].mxu0 }
 0x582   : > { %v820_v54 = vadd.f32 %v819_v53, %v773_v49  ;;  %v1467_v55 = vpop.f32.mrb[13].mxu0 }
 0x583   : > { %v822_v56 = vpop.f32.mrb[14].mxu0 }
 0x584   : > { %v1468_v58 = vpop.f32.mrb[15].mxu0 }
 0x585   : > { %v868_v59 = vpop.f32.mrb[20].mxu1 }
 0x586   : > { %v874_v60 = vpack.c.bf16 %v868_v59, %v868_v59  ;;  %v1473_v61 = vpop.f32.mrb[21].mxu1 }
 0x587   : > { %v871_v63 = vpop.f32.mrb[22].mxu1 }
 0x588   : > { %v1474_v1 = vpop.f32.mrb[23].mxu1  ;;  %1478 = vmatmul.mubr.msk.bf16.vlgmr.msra.gmra.mrb[16].mxu0 %vm388_vm2, %v874_v60  ;;  %v1137_v63 = vsub.s32 5, %v2017_v8 }
 0x589   : > { %1488 = vmatpush3.bf16.msra.mxu0 %v980_v62  ;;  %1489 = vmatprep.mubr.msk.bf16.mxu0 %vm1790_vm0, %v1789_v0 }
 0x58a   : > { %1501 = vmatprep.subr.bf16.mxu0 %v1789_v0  ;;  %v1138_v1 = vrot.slane %v2020_v10, %v1137_v63 }
 0x58d   : > { %v967_v2 = vpop.f32.mrb[24].mxu1 }
 0x58e   : > { %v973_v3 = vpack.c.bf16 %v967_v2, %v967_v2  ;;  %v1485_v4 = vpop.f32.mrb[25].mxu1 }
 0x58f   : > { %v970_v6 = vpop.f32.mrb[26].mxu1 }
 0x590   : > { %v1486_v7 = vpop.f32.mrb[27].mxu1  ;;  %1490 = vmatmul.mubr.msk.bf16.vlgmr.msra.gmra.mrb[20].mxu0 %vm388_vm2, %v973_v3 }
 0x591   : > { %1509 = vmatprep.mubr.msk.bf16.mxu0 %vm1790_vm0, %v1789_v0  ;;  %1502 = vmatpush3.bf16.msra.mxu0 %v1602_v43 }
 0x592   : > { %1503 = vmatprep.subr.bf16.mxu0 %v1789_v0 }
 0x595   : > { %1504 = vmatpush3.bf16.msra.mxu0 %v1603_v44 }
 0x596   : > { %1505 = vmatprep.subr.bf16.mxu0 %v1789_v0 }
 0x599   : > { %1506 = vmatpush3.bf16.msra.mxu0 %v1604_v45 }
 0x59a   : > { %1507 = vmatprep.subr.bf16.mxu0 %v1789_v0 }
 0x59d   : > { %1508 = vmatpush3.bf16.msra.mxu0 %v1605_v46 }
 0x65b   : > { %v917_v9 = vpop.f32.mrb[16].mxu0 }
 0x65c   : > { %v923_v11 = vadd.f32 %v917_v9, %v820_v54  ;;  %v1479_v12 = vpop.f32.mrb[17].mxu0 }
 0x65d   : > { %v920_v13 = vpop.f32.mrb[18].mxu0 }
 0x65e   : > { %v1480_v14 = vpop.f32.mrb[19].mxu0 }
 0x663   : > { %v1016_v16 = vpop.f32.mrb[20].mxu0 }
 0x664   : > { %v1022_v18 = vadd.f32 %v1016_v16, %v923_v11  ;;  %v1491_v19 = vpop.f32.mrb[21].mxu0 }
 0x665   : > { %v1019_v20 = vpop.f32.mrb[22].mxu0 }
 0x666   : > { %v1027_v21 = vadd.f32 %v1026_v17, %v1022_v18  ;;  %v1492_v22 = vpop.f32.mrb[23].mxu0  ;;  %v1223_v20 = vsub.s32 6, %v2017_v8 }
 0x668   : > { %v1028_v23 = vadd.f32 %v1027_v21, %v2009_v5  ;;  %v1045_v5 = vsub.s32 2, %v2017_v8  ;;  %v1228_v21 = vsub.s32 7, %v2017_v8  ;;  %v1224_v22 = vrot.slane %v2020_v10, %v1223_v20 }
 0x66a   : > { %v1029_v24 = vsel %vm340_vm1, %v1028_v23, 0.0  ;;  %v1046_v36 = vrot.slane %v2020_v10, %v1045_v5 }
 0x66b   : > { %1030 = vadd.xlane.f32.xlu0 %v1029_v24 }
 0x6f8   : > { %v1031_v25 = vpop.xlane.xlu0 %1030 }
 0x6f9   : > { %v1033_v26 = vmul.f32 0.03125, %v1031_v25  ;;  %v1229_v25 = vrot.slane %v2020_v10, %v1228_v21 }
 0x6fb   : > { %v1034_v27 = vsub.f32 %v1028_v23, %v1033_v26 }
 0x6fd   : > { %v1035_v28 = vmul.f32 %v1034_v27, %v1034_v27 }
 0x6ff   : > { %v1036_v29 = vsel %vm340_vm1, %v1035_v28, 0.0 }
 0x700   : > { %1037 = vadd.xlane.f32.xlu1 %v1036_v29 }
 0x78d   : > { %v1038_v32 = vpop.xlane.xlu1 %1037 }
 0x78e   : > { %v1039_v33 = vmul.f32 0.03125, %v1038_v32 }
 0x790   : > { %v1040_v34 = vadd.f32 1e-05, %v1039_v33 }
 0x792   : > { %1622 = vrsqrt.f32 %v1040_v34 }
 0x79c   : > { %v1623_v37 = vpop.eup %1622 }
 0x79d   : > { %v1042_v38 = vmul.f32 %v1623_v37, %v1034_v27 }
 0x79f   : > { %v1047_v40 = vmul.f32 %v1046_v36, %v1042_v38 }
 0x7a1   : > { %v1052_v41 = vadd.f32 %v1051_v39, %v1047_v40 }
 0x7a3   : > { %v1053_v42 = vpack.c.bf16 %v1052_v41, %v1052_v41 }
 0x7a5   : > { %1498 = vmatmul.mubr.msk.bf16.vlgmr.msra.gmra.mrb[28].mxu1 %vm340_vm1, %v1053_v42 }
 0x878   : > { %v1111_v49 = vpop.f32.mrb[28].mxu1 }
 0x879   : > { %v1112_v50 = vadd.f32 %v1111_v49, %v1061_v48  ;;  %v1499_v51 = vpop.f32.mrb[29].mxu1 }
 0x87a   : > { %v1114_v52 = vpop.f32.mrb[30].mxu1 }
 0x87b   : > { %v1118_v53 = vmul.f32 0.044715, %v1112_v50  ;;  %v1500_v54 = vpop.f32.mrb[31].mxu1  ;;  %v1117_v60 = vmul.f32 0.5, %v1112_v50 }
 0x87d   : > { %v1119_v55 = vmul.f32 %v1118_v53, %v1112_v50 }
 0x87f   : > { %v1120_v56 = vmul.f32 %v1119_v55, %v1112_v50 }
 0x881   : > { %v1121_v57 = vadd.f32 %v1120_v56, %v1112_v50 }
 0x883   : > { %v1122_v58 = vmul.f32 0.7978846, %v1121_v57 }
 0x885   : > { %1624 = vtanh.f32 %v1122_v58 }
 0x88f   : > { %v1625_v59 = vpop.eup %1624 }
 0x890   : > { %v1124_v61 = vadd.f32 1.0, %v1625_v59 }
 0x892   : > { %v1125_v0 = vmul.f32 %v1124_v61, %v1117_v60 }
 0x894   : > { %v1126_v62 = vpack.c.bf16 %v1125_v0, %v1125_v0 }
 0x896   : > { %1510 = vmatmul.mubr.msk.bf16.vlgmr.msra.gmra.mrb[24].mxu0 %vm1163_vm4, %v1126_v62 }
 0x969   : > { %v1201_v2 = vpop.f32.mrb[24].mxu0 }
 0x96a   : > { %v1202_v3 = vadd.f32 %v1201_v2, %v1138_v1  ;;  %v1511_v4 = vpop.f32.mrb[25].mxu0 }
 0x96b   : > { %v1204_v6 = vpop.f32.mrb[26].mxu0 }
 0x96c   : > { %v1512_v7 = vpop.f32.mrb[27].mxu0  ;;  %v1207_v9 = vadd.f32 %v1202_v3, %v1052_v41 }
 0x96e   : > { %v1208_v11 = vsel %vm340_vm1, %v1207_v9, 0.0 }
 0x96f   : > { %1209 = vadd.xlane.f32.xlu0 %v1208_v11 }
 0x9fc   : > { %v1210_v12 = vpop.xlane.xlu0 %1209 }
 0x9fd   : > { %v1211_v13 = vmul.f32 0.03125, %v1210_v12 }
 0x9ff   : > { %v1212_v14 = vsub.f32 %v1207_v9, %v1211_v13 }
 0xa01   : > { %v1213_v15 = vmul.f32 %v1212_v14, %v1212_v14 }
 0xa03   : > { %v1214_v17 = vsel %vm340_vm1, %v1213_v15, 0.0 }
 0xa04   : > { %1215 = vadd.xlane.f32.xlu0 %v1214_v17 }
 0xa91   : > { %v1216_v16 = vpop.xlane.xlu0 %1215 }
 0xa92   : > { %v1217_v18 = vmul.f32 0.03125, %v1216_v16 }
 0xa94   : > { %v1218_v19 = vadd.f32 1e-05, %v1217_v18 }
 0xa96   : > { %1626 = vrsqrt.f32 %v1218_v19 }
 0xaa0   : > { %v1627_v23 = vpop.eup %1626 }
 0xaa1   : > { %v1220_v24 = vmul.f32 %v1627_v23, %v1212_v14 }
 0xaa3   : > { %v1225_v26 = vmul.f32 %v1224_v22, %v1220_v24 }
 0xaa5   : > { %v1230_v27 = vadd.f32 %v1229_v25, %v1225_v26 }
 0xaa7   : > { %1231 = vst.msk [vmem:[%s309_s26] sm:$0xff] %vm340_vm1, %v1230_v27 }
 0xaa8   : > { %1725 = shalt.err (!%p1722_p9)
}
 0xaa9   : > { %s1726_s17 = scalar_lea.hbm %s2162_s22, 128  ;;  %s1730_s13 = scalar_lea.hbm %s2212_s7, 256 }
 0xaaa   : > { %p1727_p2 = scmp.ne.s32.totalorder %s2162_s22, %s1726_s17  ;;  %p1731_p4 = scmp.lt.u32.totalorder %s2162_s22, %s2212_s7 }
 0xaab   : > { %p1732_p5 = scmp.lt.u32.totalorder %s1730_s13, %s1726_s17  ;;  %p1734_p12 = scmp.lt.u32.totalorder %s1726_s17, %s2162_s22 }
 0xaac   : > { %p1728_p3 = pnand %p1727_p2, %p2232_p7 }
 0xaad   : > { %p1733_p10 = por %p1732_p5, %p1731_p4 }
 0xaae   : > { %p1729_p0 = pneg %p1728_p3 }
 0xaaf   : > { %p1735_p8 = por %p1734_p12, %p1733_p10 }
 0xab1   : > { %p1736_p11 = pnand %p1735_p8, %p1729_p0 }
 0xab3   : > { %1739 = shalt.err (!%p1736_p11)
}
 0xab4   : > { %1525 = dma.vmem_to_hbm [thread:$0]  (%p2232_p7), %s2164_s30, 128, %s2162_s22, %s1233_s23  }
 0xab5 PF: > { %p1547_p13 = scmp.ge.s32.totalorder %s1782_s27, 2  ;;  %s1258_s9 = sand.u32 1, %s1770_s24  }
 0xab6   : > { %p2233_p1 = scmp.ne.s32.totalorder %s2223_s12, 0  ;;  %s1259_s15 = scalar_lea.sflag [#allocation4], %s1258_s9 }
 0xab8   : > { %p1538_p6 = pnand %p1547_p13, %p2233_p1 }
 0xaba   : > { %1765 = dma.done.wait (!%p1538_p6), %s1259_s15, 128  }
 0xabb   : > { %1767 = vsyncadd (!%p1538_p6), %s1259_s15, 4294967168  ;;  %s2234_s27 = sld [smem:[#allocation13_spill]]  ;;  %s2235_s26 = sld [smem:[#allocation12_spill]] }
 0xabc   : > { %s2236_s10 = sld [smem:[#allocation14_spill]]  ;;  %s2237_s24 = smov %s1774_s25 }
 0xac1   : > { %p19_p9 = scmp.ge.s32.totalorder %s2234_s27, 4   ;;  %s2238_s25 = smov %s2235_s26 }
 0xac2   : > { %s2239_s26 = smov %s2236_s10 }
 0xac3   :  { %21 = sbr.rel (!%p19_p9) target bundleno = 5 (0x5), region = 99 }
 0xaca   :  { %1264 = vsyncpa [#allocation3], 1 }
 0xacb   :  { %1266 = vsyncpa [#allocation3 + $0x1], 1 }
 0xacc   :  { %1267 = vsyncpa [#allocation6], 1 }
 0xacd   :  { %1268 = vsyncpa [#allocation4], 1 }
 0xace   :  { %1270 = vsyncpa [#allocation4 + $0x1], 1 }

</bundles_post_ra>
